<compile_context>
chip_gen: v7x
topology: tpu7x:2x2x1
jax: 0.10.0
libtpu: 0.0.40
codegen_flags: <defaults>
</compile_context>

<pallas_src>
import functools

import jax
import jax.numpy as jnp
from jax.experimental import pallas as pl
from jax.experimental.pallas import tpu as pltpu


# Below this many output rows per block the row-interleaved store is fully unrolled into
# static single-row stores (guaranteed to lower; used by the test shapes).  Larger blocks
# use one sublane-strided store per kernel slot.
_UNROLLED_STORE_ROWS = 128


def _patch_embed_fused_kernel(x_ref, w_ref, b_ref, o_ref):
    """One grid step = one (b, d, i, j, h): scatter a (W*kw, E) token slab.

    x_ref: (W, C)       compute dtype   voxel rows of (b, d, h)
    w_ref: (kw, C, E)   compute dtype   weight slots (i, j, k) as (C, E) matrices
    b_ref: (1, E)       f32             bias
    o_ref: (W*kw, E)    out dtype       token rows n0 + w*kw + k  (w major, k minor)
    """
    n_w = x_ref.shape[0]
    kw = w_ref.shape[0]
    x = x_ref[...]                       # reused across all kw matmuls
    bias = b_ref[...]
    for k in range(kw):                  # kw is small & static -> unrolled
        acc = jnp.dot(x, w_ref[k], preferred_element_type=jnp.float32) + bias  # (W, E) f32
        if kw == 1:
            o_ref[...] = acc.astype(o_ref.dtype)
        elif n_w * kw <= _UNROLLED_STORE_ROWS:
            # Guaranteed-to-lower interleave: static single-row stores into the VMEM block.
            for w in range(n_w):
                o_ref[pl.ds(w * kw + k, 1), :] = acc[w:w + 1, :].astype(o_ref.dtype)
        else:
            # Large blocks: one sublane-strided store per kernel-slot k.
            # TODO(synk): validate strided-store lowering on all generations; fall back to a
            #             VMEM-scratch + fori_loop row copy if it ever rejects.
            o_ref[pl.ds(k, n_w, stride=kw), :] = acc.astype(o_ref.dtype)


def _round_up(v, m):
    return ((v + m - 1) // m) * m


def _sublane_multiple(dtype):
    return max(8, 32 // jnp.dtype(dtype).itemsize)   # f32 -> 8, bf16 -> 16


def _vmem_limit_bytes(n_w, C, kw, E, compute_dtype, out_dtype):
    """Padding-aware per-step VMEM estimate -> modest scoped-VMEM request (<= 96 MiB)."""
    cd = jnp.dtype(compute_dtype).itemsize
    od = jnp.dtype(out_dtype).itemsize
    x_tile = _round_up(n_w, _sublane_multiple(compute_dtype)) * _round_up(C, 128) * cd
    w_tile = kw * _round_up(C, _sublane_multiple(compute_dtype)) * _round_up(E, 128) * cd
    b_tile = 8 * _round_up(E, 128) * 4
    o_tile = _round_up(n_w * kw, _sublane_multiple(out_dtype)) * _round_up(E, 128) * od
    usage = 2 * (x_tile + w_tile + b_tile + o_tile)      # double-buffered pipeline
    return int(min(96 << 20, max(32 << 20, 4 * usage + (4 << 20))))


@functools.partial(jax.jit, static_argnames=("patch_size", "out_dtype", "compute_dtype"))
def patch_embed_forward(x, weight, bias, patch_size,
                        out_dtype=jnp.bfloat16, compute_dtype=jnp.bfloat16):
    """Forward pass of PatchEmbed.

    x:      (B, C, D, H, W)        NCDHW input
    weight: (C, E, kd, kh, kw)     ConvTranspose3d weight (in_chans, embed_dim, *kernel)
    bias:   (E,)
    Returns (tokens, out_spatial); tokens is (B, D*kd*H*kh*W*kw, E) in `out_dtype`
    (bf16 by default since the op is output-HBM-bound; pass out_dtype=jnp.float32 /
    compute_dtype=jnp.float32 to opt out).

    NOTE: out_spatial is intentionally bug-compatible with the PyTorch source: it returns
          (D*kd, H*kh, W*kh), i.e. patch_size[1] is used for the W axis.
    """
    B, C, D, H, W = x.shape
    kd, kh, kw = patch_size
    E = weight.shape[1]
    N = D * kd * H * kh * W * kw

    # The fused out BlockSpec carves (W*kw, E) sub-blocks out of the (N, E) token plane.
    row_mult = 16 if jnp.dtype(out_dtype).itemsize < 4 else 8
    if (W * kw) % row_mult != 0:
        raise NotImplementedError(
            f"W * patch_size[2] = {W * kw} must be a multiple of {row_mult} for the fused "
            f"token-scatter kernel (out_dtype={jnp.dtype(out_dtype).name}).")

    # Prologue casts/transposes touch only the input/weight, which are ~kd*kh*kw*E/C times
    # smaller than the output -> negligible next to the eliminated output epilogue pass.
    x_ndhwc = jnp.transpose(x, (0, 2, 3, 4, 1)).astype(compute_dtype)       # (B, D, H, W, C)
    w_slots = jnp.transpose(weight, (2, 3, 4, 0, 1)).astype(compute_dtype)  # (kd, kh, kw, C, E)
    b_row = bias.astype(jnp.float32).reshape(1, E)

    grid = (B, D, kd, kh, H)   # h innermost -> the weight block is reused across H steps
    out_block_rows = W * kw

    cd = jnp.dtype(compute_dtype).itemsize
    od = jnp.dtype(out_dtype).itemsize
    cost = pl.CostEstimate(
        flops=2 * B * D * H * W * C * kd * kh * kw * E,
        transcendentals=0,
        bytes_accessed=(B * D * H * W * C * cd) + (C * E * kd * kh * kw * cd)
        + E * 4 + (B * N * E * od),
    )

    tokens = pl.pallas_call(
        _patch_embed_fused_kernel,
        out_shape=jax.ShapeDtypeStruct((B, N, E), out_dtype),
        grid=grid,
        in_specs=[
            # voxel rows of (b, d, h): tiny, re-fetched per step.
            pl.BlockSpec((None, None, None, W, C), lambda b, d, i, j, h: (b, d, h, 0, 0)),
            # weight slots (i, j, :): streamed per (i, j); constant over the innermost h axis.
            pl.BlockSpec((None, None, kw, C, E), lambda b, d, i, j, h: (i, j, 0, 0, 0)),
            pl.BlockSpec((1, E), lambda b, d, i, j, h: (0, 0)),
        ],
        # Fused scatter: the (W*kw, E) slab lands at token rows (((d*kd+i)*H+h)*kh+j)*W*kw.
        out_specs=pl.BlockSpec(
            (None, out_block_rows, E),
            lambda b, d, i, j, h: (b, ((d * kd + i) * H + h) * kh + j, 0),
        ),
        compiler_params=pltpu.CompilerParams(
            dimension_semantics=("parallel",) * len(grid),
            vmem_limit_bytes=_vmem_limit_bytes(W, C, kw, E, compute_dtype, out_dtype),
        ),
        cost_estimate=cost,
    )(x_ndhwc, w_slots, b_row)

    # Bug-compatible with the PyTorch module (W axis uses patch_size[1]).
    out_spatial = (D * kd, H * kh, W * kh)
    return tokens, out_spatial


def _reference_forward(x, weight, bias, patch_size):
    """Pure-JAX reference: per-voxel projection scattered into the token layout."""
    B, C, D, H, W = x.shape
    kd, kh, kw = patch_size
    E = weight.shape[1]
    y = jnp.einsum("bcdhw,ceijk->bdihjwke", x, weight) + bias
    return y.reshape(B, D * kd * H * kh * W * kw, E)


if __name__ == "__main__":
    # Small, forward-consistent shapes: batch=2, in_chans=4, spatial (4, 4, 8),
    # patch_size=(2, 2, 2), embed_dim=128 (multiple of 128 -> lane-dense stores;
    # W*kw = 16 -> sublane-aligned token slabs for both bf16 and f32 outputs).
    B, C = 2, 4
    D, H, W = 4, 4, 8
    patch_size = (2, 2, 2)
    E = 128

    key = jax.random.PRNGKey(0)
    kx, kw_key, kb = jax.random.split(key, 3)
    x = jax.random.normal(kx, (B, C, D, H, W), jnp.float32)
    # ConvTranspose3d weight layout: (in_chans, embed_dim, kd, kh, kw)
    weight = jax.random.normal(kw_key, (C, E) + patch_size, jnp.float32) * 0.02
    bias = jax.random.normal(kb, (E,), jnp.float32) * 0.02

    kd, kh, kw = patch_size
    N = D * kd * H * kh * W * kw

    # Default path: bf16 compute + bf16 output (the op is output-HBM-bound).
    tokens, out_spatial = patch_embed_forward(x, weight, bias, patch_size)
    tokens = jax.block_until_ready(tokens)
    assert tokens.shape == (B, N, E), tokens.shape
    assert tokens.dtype == jnp.bfloat16, tokens.dtype
    assert out_spatial == (D * kd, H * kh, W * kh)   # bug-compatible with the PyTorch source

    ref_bf16 = _reference_forward(
        x.astype(jnp.bfloat16).astype(jnp.float32),
        weight.astype(jnp.bfloat16).astype(jnp.float32),
        bias, patch_size)
    err = jnp.max(jnp.abs(tokens.astype(jnp.float32) - ref_bf16))
    assert err < 5e-3, f"bf16 path mismatch vs reference: max abs err {err}"

    # f32 opt-out path (compute + output in f32).
    tokens32, _ = patch_embed_forward(x, weight, bias, patch_size,
                                      out_dtype=jnp.float32, compute_dtype=jnp.float32)
    tokens32 = jax.block_until_ready(tokens32)
    ref32 = _reference_forward(x, weight, bias, patch_size)
    err32 = jnp.max(jnp.abs(tokens32 - ref32))
    assert err32 < 1e-2, f"f32 path mismatch vs reference: max abs err {err32}"

    print("KERNEL_OK")
</pallas_src>

<mosaic_0001>
module attributes {stable_mosaic.version = 11 : i64} {
  func.func @_patch_embed_fused_kernel(%arg0: i32, %arg1: i32, %arg2: i32, %arg3: i32, %arg4: i32, %arg5: memref<1x1x1x8x4xbf16, #tpu.memory_space<vmem>>, %arg6: memref<1x1x2x4x128xbf16, #tpu.memory_space<vmem>>, %arg7: memref<1x128xf32, #tpu.memory_space<vmem>>, %arg8: memref<1x16x128xbf16, #tpu.memory_space<vmem>>) attributes {dimension_semantics = [#tpu.dimension_semantics<parallel>, #tpu.dimension_semantics<parallel>, #tpu.dimension_semantics<parallel>, #tpu.dimension_semantics<parallel>, #tpu.dimension_semantics<parallel>], iteration_bounds = array<i64: 2, 4, 2, 2, 4>, scalar_prefetch = 0 : i64, scratch_operands = 0 : i64, tpu.core_type = #tpu.core_type<tc>, window_params = [{transform_indices = @transform_0, window_bounds = array<i64: 1, 1, 1, 8, 4>}, {transform_indices = @transform_1, window_bounds = array<i64: 1, 1, 2, 4, 128>}, {pipeline_mode = #tpu.pipeline_mode<synchronous>, transform_indices = @transform_2, window_bounds = array<i64: 1, 128>}, {transform_indices = @transform_3, window_bounds = array<i64: 1, 16, 128>}]} {
    %c0 = arith.constant 0 : index
    %c0_0 = arith.constant 0 : index
    %c0_1 = arith.constant 0 : index
    %c0_2 = arith.constant 0 : index
    %c0_3 = arith.constant 0 : index
    %0 = vector.load %arg5[%c0, %c0_0, %c0_1, %c0_2, %c0_3] : memref<1x1x1x8x4xbf16, #tpu.memory_space<vmem>>, vector<1x1x1x8x4xbf16>
    %1 = vector.shape_cast %0 : vector<1x1x1x8x4xbf16> to vector<8x4xbf16>
    %c0_4 = arith.constant 0 : index
    %c0_5 = arith.constant 0 : index
    %2 = vector.load %arg7[%c0_4, %c0_5] : memref<1x128xf32, #tpu.memory_space<vmem>>, vector<1x128xf32>
    %c0_6 = arith.constant 0 : index
    %c0_7 = arith.constant 0 : index
    %c0_8 = arith.constant 0 : index
    %c0_9 = arith.constant 0 : index
    %c0_10 = arith.constant 0 : index
    %3 = vector.load %arg6[%c0_6, %c0_7, %c0_8, %c0_9, %c0_10] : memref<1x1x2x4x128xbf16, #tpu.memory_space<vmem>>, vector<1x1x1x4x128xbf16>
    %4 = vector.shape_cast %3 : vector<1x1x1x4x128xbf16> to vector<4x128xbf16>
    %cst = arith.constant dense<0.000000e+00> : vector<8x128xf32>
    %5 = tpu.matmul %1, %4, %cst {dimension_numbers = #tpu.dot_dimension_numbers<[1], [0], [0], [1], [0, 0, 1, 1], [], []>} : vector<8x4xbf16>, vector<4x128xbf16>, vector<8x128xf32> -> vector<8x128xf32>
    %6 = vector.broadcast %2 : vector<1x128xf32> to vector<8x128xf32>
    %7 = arith.addf %5, %6 : vector<8x128xf32>
    %8 = vector.extract_strided_slice %7 {offsets = [0, 0], sizes = [1, 128], strides = [1, 1]} : vector<8x128xf32> to vector<1x128xf32>
    %9 = arith.truncf %8 : vector<1x128xf32> to vector<1x128xbf16>
    %c0_11 = arith.constant 0 : index
    %c0_12 = arith.constant 0 : index
    %c0_13 = arith.constant 0 : index
    %10 = vector.load %arg8[%c0_11, %c0_12, %c0_13] : memref<1x16x128xbf16, #tpu.memory_space<vmem>>, vector<1x1x128xbf16>
    %11 = vector.shape_cast %10 : vector<1x1x128xbf16> to vector<1x128xbf16>
    %12 = vector.shape_cast %9 : vector<1x128xbf16> to vector<1x1x128xbf16>
    tpu.vector_store %arg8[%c0_11, %c0_12, %c0_13], %12 {strides = array<i32>} : memref<1x16x128xbf16, #tpu.memory_space<vmem>>, vector<1x1x128xbf16>,
    %13 = vector.extract_strided_slice %7 {offsets = [1, 0], sizes = [1, 128], strides = [1, 1]} : vector<8x128xf32> to vector<1x128xf32>
    %14 = arith.truncf %13 : vector<1x128xf32> to vector<1x128xbf16>
    %c0_14 = arith.constant 0 : index
    %c2 = arith.constant 2 : index
    %c0_15 = arith.constant 0 : index
    %15 = vector.load %arg8[%c0_14, %c2, %c0_15] : memref<1x16x128xbf16, #tpu.memory_space<vmem>>, vector<1x1x128xbf16>
    %16 = vector.shape_cast %15 : vector<1x1x128xbf16> to vector<1x128xbf16>
    %17 = vector.shape_cast %14 : vector<1x128xbf16> to vector<1x1x128xbf16>
    tpu.vector_store %arg8[%c0_14, %c2, %c0_15], %17 {strides = array<i32>} : memref<1x16x128xbf16, #tpu.memory_space<vmem>>, vector<1x1x128xbf16>,
    %18 = vector.extract_strided_slice %7 {offsets = [2, 0], sizes = [1, 128], strides = [1, 1]} : vector<8x128xf32> to vector<1x128xf32>
    %19 = arith.truncf %18 : vector<1x128xf32> to vector<1x128xbf16>
    %c0_16 = arith.constant 0 : index
    %c4 = arith.constant 4 : index
    %c0_17 = arith.constant 0 : index
    %20 = vector.load %arg8[%c0_16, %c4, %c0_17] : memref<1x16x128xbf16, #tpu.memory_space<vmem>>, vector<1x1x128xbf16>
    %21 = vector.shape_cast %20 : vector<1x1x128xbf16> to vector<1x128xbf16>
    %22 = vector.shape_cast %19 : vector<1x128xbf16> to vector<1x1x128xbf16>
    tpu.vector_store %arg8[%c0_16, %c4, %c0_17], %22 {strides = array<i32>} : memref<1x16x128xbf16, #tpu.memory_space<vmem>>, vector<1x1x128xbf16>,
    %23 = vector.extract_strided_slice %7 {offsets = [3, 0], sizes = [1, 128], strides = [1, 1]} : vector<8x128xf32> to vector<1x128xf32>
    %24 = arith.truncf %23 : vector<1x128xf32> to vector<1x128xbf16>
    %c0_18 = arith.constant 0 : index
    %c6 = arith.constant 6 : index
    %c0_19 = arith.constant 0 : index
    %25 = vector.load %arg8[%c0_18, %c6, %c0_19] : memref<1x16x128xbf16, #tpu.memory_space<vmem>>, vector<1x1x128xbf16>
    %26 = vector.shape_cast %25 : vector<1x1x128xbf16> to vector<1x128xbf16>
    %27 = vector.shape_cast %24 : vector<1x128xbf16> to vector<1x1x128xbf16>
    tpu.vector_store %arg8[%c0_18, %c6, %c0_19], %27 {strides = array<i32>} : memref<1x16x128xbf16, #tpu.memory_space<vmem>>, vector<1x1x128xbf16>,
    %28 = vector.extract_strided_slice %7 {offsets = [4, 0], sizes = [1, 128], strides = [1, 1]} : vector<8x128xf32> to vector<1x128xf32>
    %29 = arith.truncf %28 : vector<1x128xf32> to vector<1x128xbf16>
    %c0_20 = arith.constant 0 : index
    %c8 = arith.constant 8 : index
    %c0_21 = arith.constant 0 : index
    %30 = vector.load %arg8[%c0_20, %c8, %c0_21] : memref<1x16x128xbf16, #tpu.memory_space<vmem>>, vector<1x1x128xbf16>
    %31 = vector.shape_cast %30 : vector<1x1x128xbf16> to vector<1x128xbf16>
    %32 = vector.shape_cast %29 : vector<1x128xbf16> to vector<1x1x128xbf16>
    tpu.vector_store %arg8[%c0_20, %c8, %c0_21], %32 {strides = array<i32>} : memref<1x16x128xbf16, #tpu.memory_space<vmem>>, vector<1x1x128xbf16>,
    %33 = vector.extract_strided_slice %7 {offsets = [5, 0], sizes = [1, 128], strides = [1, 1]} : vector<8x128xf32> to vector<1x128xf32>
    %34 = arith.truncf %33 : vector<1x128xf32> to vector<1x128xbf16>
    %c0_22 = arith.constant 0 : index
    %c10 = arith.constant 10 : index
    %c0_23 = arith.constant 0 : index
    %35 = vector.load %arg8[%c0_22, %c10, %c0_23] : memref<1x16x128xbf16, #tpu.memory_space<vmem>>, vector<1x1x128xbf16>
    %36 = vector.shape_cast %35 : vector<1x1x128xbf16> to vector<1x128xbf16>
    %37 = vector.shape_cast %34 : vector<1x128xbf16> to vector<1x1x128xbf16>
    tpu.vector_store %arg8[%c0_22, %c10, %c0_23], %37 {strides = array<i32>} : memref<1x16x128xbf16, #tpu.memory_space<vmem>>, vector<1x1x128xbf16>,
    %38 = vector.extract_strided_slice %7 {offsets = [6, 0], sizes = [1, 128], strides = [1, 1]} : vector<8x128xf32> to vector<1x128xf32>
    %39 = arith.truncf %38 : vector<1x128xf32> to vector<1x128xbf16>
    %c0_24 = arith.constant 0 : index
    %c12 = arith.constant 12 : index
    %c0_25 = arith.constant 0 : index
    %40 = vector.load %arg8[%c0_24, %c12, %c0_25] : memref<1x16x128xbf16, #tpu.memory_space<vmem>>, vector<1x1x128xbf16>
    %41 = vector.shape_cast %40 : vector<1x1x128xbf16> to vector<1x128xbf16>
    %42 = vector.shape_cast %39 : vector<1x128xbf16> to vector<1x1x128xbf16>
    tpu.vector_store %arg8[%c0_24, %c12, %c0_25], %42 {strides = array<i32>} : memref<1x16x128xbf16, #tpu.memory_space<vmem>>, vector<1x1x128xbf16>,
    %43 = vector.extract_strided_slice %7 {offsets = [7, 0], sizes = [1, 128], strides = [1, 1]} : vector<8x128xf32> to vector<1x128xf32>
    %44 = arith.truncf %43 : vector<1x128xf32> to vector<1x128xbf16>
    %c0_26 = arith.constant 0 : index
    %c14 = arith.constant 14 : index
    %c0_27 = arith.constant 0 : index
    %45 = vector.load %arg8[%c0_26, %c14, %c0_27] : memref<1x16x128xbf16, #tpu.memory_space<vmem>>, vector<1x1x128xbf16>
    %46 = vector.shape_cast %45 : vector<1x1x128xbf16> to vector<1x128xbf16>
    %47 = vector.shape_cast %44 : vector<1x128xbf16> to vector<1x1x128xbf16>
    tpu.vector_store %arg8[%c0_26, %c14, %c0_27], %47 {strides = array<i32>} : memref<1x16x128xbf16, #tpu.memory_space<vmem>>, vector<1x1x128xbf16>,
    %c0_28 = arith.constant 0 : index
    %c0_29 = arith.constant 0 : index
    %c1 = arith.constant 1 : index
    %c0_30 = arith.constant 0 : index
    %c0_31 = arith.constant 0 : index
    %48 = vector.load %arg6[%c0_28, %c0_29, %c1, %c0_30, %c0_31] : memref<1x1x2x4x128xbf16, #tpu.memory_space<vmem>>, vector<1x1x1x4x128xbf16>
    %49 = vector.shape_cast %48 : vector<1x1x1x4x128xbf16> to vector<4x128xbf16>
    %cst_32 = arith.constant dense<0.000000e+00> : vector<8x128xf32>
    %50 = tpu.matmul %1, %49, %cst_32 {dimension_numbers = #tpu.dot_dimension_numbers<[1], [0], [0], [1], [0, 0, 1, 1], [], []>} : vector<8x4xbf16>, vector<4x128xbf16>, vector<8x128xf32> -> vector<8x128xf32>
    %51 = vector.broadcast %2 : vector<1x128xf32> to vector<8x128xf32>
    %52 = arith.addf %50, %51 : vector<8x128xf32>
    %53 = vector.extract_strided_slice %52 {offsets = [0, 0], sizes = [1, 128], strides = [1, 1]} : vector<8x128xf32> to vector<1x128xf32>
    %54 = arith.truncf %53 : vector<1x128xf32> to vector<1x128xbf16>
    %c0_33 = arith.constant 0 : index
    %c1_34 = arith.constant 1 : index
    %c0_35 = arith.constant 0 : index
    %55 = vector.load %arg8[%c0_33, %c1_34, %c0_35] : memref<1x16x128xbf16, #tpu.memory_space<vmem>>, vector<1x1x128xbf16>
    %56 = vector.shape_cast %55 : vector<1x1x128xbf16> to vector<1x128xbf16>
    %57 = vector.shape_cast %54 : vector<1x128xbf16> to vector<1x1x128xbf16>
    tpu.vector_store %arg8[%c0_33, %c1_34, %c0_35], %57 {strides = array<i32>} : memref<1x16x128xbf16, #tpu.memory_space<vmem>>, vector<1x1x128xbf16>,
    %58 = vector.extract_strided_slice %52 {offsets = [1, 0], sizes = [1, 128], strides = [1, 1]} : vector<8x128xf32> to vector<1x128xf32>
    %59 = arith.truncf %58 : vector<1x128xf32> to vector<1x128xbf16>
    %c0_36 = arith.constant 0 : index
    %c3 = arith.constant 3 : index
    %c0_37 = arith.constant 0 : index
    %60 = vector.load %arg8[%c0_36, %c3, %c0_37] : memref<1x16x128xbf16, #tpu.memory_space<vmem>>, vector<1x1x128xbf16>
    %61 = vector.shape_cast %60 : vector<1x1x128xbf16> to vector<1x128xbf16>
    %62 = vector.shape_cast %59 : vector<1x128xbf16> to vector<1x1x128xbf16>
    tpu.vector_store %arg8[%c0_36, %c3, %c0_37], %62 {strides = array<i32>} : memref<1x16x128xbf16, #tpu.memory_space<vmem>>, vector<1x1x128xbf16>,
    %63 = vector.extract_strided_slice %52 {offsets = [2, 0], sizes = [1, 128], strides = [1, 1]} : vector<8x128xf32> to vector<1x128xf32>
    %64 = arith.truncf %63 : vector<1x128xf32> to vector<1x128xbf16>
    %c0_38 = arith.constant 0 : index
    %c5 = arith.constant 5 : index
    %c0_39 = arith.constant 0 : index
    %65 = vector.load %arg8[%c0_38, %c5, %c0_39] : memref<1x16x128xbf16, #tpu.memory_space<vmem>>, vector<1x1x128xbf16>
    %66 = vector.shape_cast %65 : vector<1x1x128xbf16> to vector<1x128xbf16>
    %67 = vector.shape_cast %64 : vector<1x128xbf16> to vector<1x1x128xbf16>
    tpu.vector_store %arg8[%c0_38, %c5, %c0_39], %67 {strides = array<i32>} : memref<1x16x128xbf16, #tpu.memory_space<vmem>>, vector<1x1x128xbf16>,
    %68 = vector.extract_strided_slice %52 {offsets = [3, 0], sizes = [1, 128], strides = [1, 1]} : vector<8x128xf32> to vector<1x128xf32>
    %69 = arith.truncf %68 : vector<1x128xf32> to vector<1x128xbf16>
    %c0_40 = arith.constant 0 : index
    %c7 = arith.constant 7 : index
    %c0_41 = arith.constant 0 : index
    %70 = vector.load %arg8[%c0_40, %c7, %c0_41] : memref<1x16x128xbf16, #tpu.memory_space<vmem>>, vector<1x1x128xbf16>
    %71 = vector.shape_cast %70 : vector<1x1x128xbf16> to vector<1x128xbf16>
    %72 = vector.shape_cast %69 : vector<1x128xbf16> to vector<1x1x128xbf16>
    tpu.vector_store %arg8[%c0_40, %c7, %c0_41], %72 {strides = array<i32>} : memref<1x16x128xbf16, #tpu.memory_space<vmem>>, vector<1x1x128xbf16>,
    %73 = vector.extract_strided_slice %52 {offsets = [4, 0], sizes = [1, 128], strides = [1, 1]} : vector<8x128xf32> to vector<1x128xf32>
    %74 = arith.truncf %73 : vector<1x128xf32> to vector<1x128xbf16>
    %c0_42 = arith.constant 0 : index
    %c9 = arith.constant 9 : index
    %c0_43 = arith.constant 0 : index
    %75 = vector.load %arg8[%c0_42, %c9, %c0_43] : memref<1x16x128xbf16, #tpu.memory_space<vmem>>, vector<1x1x128xbf16>
    %76 = vector.shape_cast %75 : vector<1x1x128xbf16> to vector<1x128xbf16>
    %77 = vector.shape_cast %74 : vector<1x128xbf16> to vector<1x1x128xbf16>
    tpu.vector_store %arg8[%c0_42, %c9, %c0_43], %77 {strides = array<i32>} : memref<1x16x128xbf16, #tpu.memory_space<vmem>>, vector<1x1x128xbf16>,
    %78 = vector.extract_strided_slice %52 {offsets = [5, 0], sizes = [1, 128], strides = [1, 1]} : vector<8x128xf32> to vector<1x128xf32>
    %79 = arith.truncf %78 : vector<1x128xf32> to vector<1x128xbf16>
    %c0_44 = arith.constant 0 : index
    %c11 = arith.constant 11 : index
    %c0_45 = arith.constant 0 : index
    %80 = vector.load %arg8[%c0_44, %c11, %c0_45] : memref<1x16x128xbf16, #tpu.memory_space<vmem>>, vector<1x1x128xbf16>
    %81 = vector.shape_cast %80 : vector<1x1x128xbf16> to vector<1x128xbf16>
    %82 = vector.shape_cast %79 : vector<1x128xbf16> to vector<1x1x128xbf16>
    tpu.vector_store %arg8[%c0_44, %c11, %c0_45], %82 {strides = array<i32>} : memref<1x16x128xbf16, #tpu.memory_space<vmem>>, vector<1x1x128xbf16>,
    %83 = vector.extract_strided_slice %52 {offsets = [6, 0], sizes = [1, 128], strides = [1, 1]} : vector<8x128xf32> to vector<1x128xf32>
    %84 = arith.truncf %83 : vector<1x128xf32> to vector<1x128xbf16>
    %c0_46 = arith.constant 0 : index
    %c13 = arith.constant 13 : index
    %c0_47 = arith.constant 0 : index
    %85 = vector.load %arg8[%c0_46, %c13, %c0_47] : memref<1x16x128xbf16, #tpu.memory_space<vmem>>, vector<1x1x128xbf16>
    %86 = vector.shape_cast %85 : vector<1x1x128xbf16> to vector<1x128xbf16>
    %87 = vector.shape_cast %84 : vector<1x128xbf16> to vector<1x1x128xbf16>
    tpu.vector_store %arg8[%c0_46, %c13, %c0_47], %87 {strides = array<i32>} : memref<1x16x128xbf16, #tpu.memory_space<vmem>>, vector<1x1x128xbf16>,
    %88 = vector.extract_strided_slice %52 {offsets = [7, 0], sizes = [1, 128], strides = [1, 1]} : vector<8x128xf32> to vector<1x128xf32>
    %89 = arith.truncf %88 : vector<1x128xf32> to vector<1x128xbf16>
    %c0_48 = arith.constant 0 : index
    %c15 = arith.constant 15 : index
    %c0_49 = arith.constant 0 : index
    %90 = vector.load %arg8[%c0_48, %c15, %c0_49] : memref<1x16x128xbf16, #tpu.memory_space<vmem>>, vector<1x1x128xbf16>
    %91 = vector.shape_cast %90 : vector<1x1x128xbf16> to vector<1x128xbf16>
    %92 = vector.shape_cast %89 : vector<1x128xbf16> to vector<1x1x128xbf16>
    tpu.vector_store %arg8[%c0_48, %c15, %c0_49], %92 {strides = array<i32>} : memref<1x16x128xbf16, #tpu.memory_space<vmem>>, vector<1x1x128xbf16>,
    return
  }
  func.func @transform_0(%arg0: i32, %arg1: i32, %arg2: i32, %arg3: i32, %arg4: i32) -> (i32, i32, i32, i32, i32) {
    %c0_i32 = arith.constant 0 : i32
    %c0_i32_0 = arith.constant 0 : i32
    %c0_i32_1 = arith.constant 0 : i32
    return %arg0, %arg1, %arg4, %c0_i32, %c0_i32_0 : i32, i32, i32, i32, i32
  }
  func.func @transform_1(%arg0: i32, %arg1: i32, %arg2: i32, %arg3: i32, %arg4: i32) -> (i32, i32, i32, i32, i32) {
    %c0_i32 = arith.constant 0 : i32
    %c0_i32_0 = arith.constant 0 : i32
    %c0_i32_1 = arith.constant 0 : i32
    %c0_i32_2 = arith.constant 0 : i32
    return %arg2, %arg3, %c0_i32, %c0_i32_0, %c0_i32_1 : i32, i32, i32, i32, i32
  }
  func.func @transform_2(%arg0: i32, %arg1: i32, %arg2: i32, %arg3: i32, %arg4: i32) -> (i32, i32) {
    %c0_i32 = arith.constant 0 : i32
    %c0_i32_0 = arith.constant 0 : i32
    %c0_i32_1 = arith.constant 0 : i32
    return %c0_i32, %c0_i32_0 : i32, i32
  }
  func.func @transform_3(%arg0: i32, %arg1: i32, %arg2: i32, %arg3: i32, %arg4: i32) -> (i32, i32, i32) {
    %c2_i32 = arith.constant 2 : i32
    %0 = arith.muli %arg1, %c2_i32 : i32
    %1 = arith.addi %0, %arg2 : i32
    %c4_i32 = arith.constant 4 : i32
    %2 = arith.muli %1, %c4_i32 : i32
    %3 = arith.addi %2, %arg4 : i32
    %c2_i32_0 = arith.constant 2 : i32
    %4 = arith.muli %3, %c2_i32_0 : i32
    %5 = arith.addi %4, %arg3 : i32
    %c0_i32 = arith.constant 0 : i32
    %c0_i32_1 = arith.constant 0 : i32
    return %arg0, %5, %c0_i32 : i32, i32, i32
  }
}

</mosaic_0001>

<bundles_post_ra>
// kernel: patch_embed_forward.1
= control target key start
LH: loop header
LB: loop body
LE: loop exit
PB: predicated region body
PF: predicated region fallthrough
CT: control target
= control target key end

     0   :  { %s1370_s0 = inlined_call_operand.vmem [shape: bf16[2,4,4,8,4], index: 0, kind: input, shape index: {}]   ;;  %s1371_s1 = inlined_call_operand.vmem [shape: bf16[2,2,2,4,128], index: 1, kind: input, shape index: {}]   ;;  %s1372_s2 = inlined_call_operand.vmem [shape: f32[1,128], index: 2, kind: input, shape index: {}]   ;;  %s1373_s3 = inlined_call_operand.hbm [shape: bf16[2,1024,128], index: 3, kind: output, shape index: {}]  }
   0x1   :  { %1385 = sst [smem:[#allocation14_spill]] %s1371_s1 }
   0x2   :  { %1386 = sst [smem:[#allocation15_spill]] %s1373_s3 }
   0x3   :  { %8 = vsyncpa [#allocation3], 0 }
   0x4   :  { %10 = vsyncpa [#allocation3 + $0x1], 0  ;;  %s1006_s12 = smov 0   ;;  %s1008_s13 = smov 0  }
   0x5   :  { %s1010_s14 = smov 0   ;;  %s1012_s15 = smov 0  }
   0x6   :  { %s1014_s16 = smov 0   ;;  %s1016_s17 = smov 0  }
   0x7   :  { %s1018_s18 = smov 0   ;;  %s1020_s19 = smov 0  }
   0x8   :  { %s1022_s20 = smov 0   ;;  %s1024_s21 = smov 0  }
   0x9   :  { %s1026_s22 = smov 0   ;;  %s1028_s23 = smov 0  }
   0xa   :  { %s1030_s24 = smov 0   ;;  %s1032_s25 = smov 0  }
   0xb LB: > { %1387 = sst [smem:[#allocation5_spill]] %s927_s12  ;;  %s656_s26 = sadd.s32 4294967295, %s979_s25   ;;  %s979_s25 = sphi %s1032_s25, %s16_s25   ;;  %s975_s24 = sphi %s1030_s24, %s1436_s24   ;;  %s971_s23 = sphi %s1028_s23, %s1435_s23   ;;  %s967_s22 = sphi %s1026_s22, %s1424_s22   ;;  %s963_s21 = sphi %s1024_s21, %s1434_s21   ;;  %s959_s20 = sphi %s1022_s20, %s1433_s20   ;;  %s955_s19 = sphi %s1020_s19, %s1432_s19   ;;  %s951_s18 = sphi %s1018_s18, %s1423_s18   ;;  %s947_s17 = sphi %s1016_s17, %s1422_s17   ;;  %s943_s16 = sphi %s1014_s16, %s1431_s16   ;;  %s939_s15 = sphi %s1012_s15, %s1421_s15   ;;  %s935_s14 = sphi %s1010_s14, %s1430_s14   ;;  %s931_s13 = sphi %s1008_s13, %s1429_s13   ;;  %s927_s12 = sphi %s1006_s12, %s1428_s12  }
   0xc   : > { %1388 = sst [smem:[#allocation6_spill]] %s959_s20  ;;  %s34_s27 = sadd.s32 1, %s959_s20 }
   0xd   : > { %1389 = sst [smem:[#allocation7_spill]] %s967_s22  ;;  %p35_p0 = scmp.ge.s32.totalorder %s34_s27, 4 }
   0xe   : > { %1390 = sst [smem:[#allocation8_spill]] %s971_s23  ;;  %s37_s28 = sadd.s32 1, %s963_s21 }
   0xf   : > { %1391 = sst [smem:[#allocation9_spill]] %s979_s25  ;;  %s657_s29 = sadd.s32 4294967294, %s979_s25  }
  0x10   : > { %s41_s30 = sadd.s32 1, %s967_s22  ;;  %s1438_s27 = smov (%p35_p0, %s34_s27), 0 }
  0x11   : > { %s1440_s28 = smov (!%p35_p0, %s37_s28), %s963_s21  ;;  %s45_s4 = sadd.s32 1, %s971_s23 }
  0x12   : > { %s658_s5 = sshll.u32 %s971_s23, 1  ;;  %p39_p1 = scmp.ge.s32.totalorder %s1440_s28, 2 }
  0x13   : > { %s133_s6 = sadd.s32 %s967_s22, %s658_s5  ;;  %p159_p2 = scmp.ne.s32.totalorder %s935_s14, %s931_s13 }
  0x14   : > { %s659_s7 = sshll.u32 %s133_s6, 2  ;;  %s1442_s28 = smov (%p39_p1, %s1440_s28), 0 }
  0x15   : > { %s1444_s30 = smov (!%p39_p1, %s41_s30), %s967_s22  ;;  %s135_s8 = sadd.s32 %s959_s20, %s659_s7 }
  0x16   : > { %p160_p3 = scmp.eq.s32.totalorder %s656_s26, 127  ;;  %p43_p4 = scmp.ge.s32.totalorder %s1444_s30, 2 }
  0x17   : > { %s49_s9 = sadd.s32 1, %s975_s24  ;;  %s660_s10 = sshll.u32 %s135_s8, 1 }
  0x18   : > { %p1094_p5 = por %p160_p3, %p159_p2  ;;  %s1446_s30 = smov (%p43_p4, %s1444_s30), 0 }
  0x19   : > { %1393 = sst [smem:[#allocation10_spill]] %s1446_s30  ;;  %s1448_s4 = smov (!%p43_p4, %s45_s4), %s971_s23 }
  0x1a   : > { %p165_p6 = scmp.ne.s32.totalorder %s931_s13, %s927_s12  ;;  %p166_p7 = scmp.eq.s32.totalorder %s657_s29, 127 }
  0x1b   : > { %p47_p8 = scmp.ge.s32.totalorder %s1448_s4, 4  ;;  %p666_p9 = scmp.ge.s32.totalorder %s979_s25, 1 }
  0x1c   : > { %p1104_p10 = por %p166_p7, %p165_p6  ;;  %p214_p11 = scmp.lt.s32.totalorder %s979_s25, 129 }
  0x1d   : > { %s1450_s4 = smov (%p47_p8, %s1448_s4), 0  ;;  %s1452_s9 = smov (!%p47_p8, %s49_s9), %s975_s24 }
  0x1e   : > { %s1394_s26 = scalar_select %p1104_p10, 1, 0 }
  0x1f   : > { %1396 = sst [smem:[#allocation12_spill]] %s1450_s4  ;;  %s661_s5 = sshll.u32 %s1450_s4, 1 }
  0x20   : > { %1395 = sst [smem:[#allocation11_spill]] %s1394_s26  ;;  %p1113_p12 = pnand %p666_p9, %p214_p11 }
  0x21   : > { %p51_p13 = scmp.ge.s32.totalorder %s1452_s9, 2  ;;  %s139_s29 = sadd.s32 %s661_s5, %s1446_s30  ;;  %v981_v0 = vmov (!%p1113_p12), 0.0   ;;  %vm982_vm0 = vmmov (!%p1113_p12), 0   ;;  %vm296_vm1 = vcmask (!%p1113_p12), 1041408   ;;  %vm292_vm2 = vcmask (!%p1113_p12), 31744  }
  0x22   : > { %s662_s7 = sshll.u32 %s139_s29, 2  ;;  %s137_s8 = sadd.s32 %s963_s21, %s660_s10  ;;  %702 = vmatprep.subr.bf16.mxu0 (!%p1113_p12), %v981_v0  ;;  %704 = vmatprep.mubr.msk.bf16.mxu0 (!%p1113_p12), %vm982_vm0, %v981_v0  ;;  %v674_v6 = vld [vmem:[%s1372_s2] ss:$0 sm:$0xff] (!%p1113_p12)  ;;  %vm341_vm3 = vcmask (!%p1113_p12), 1040384   ;;  %vm342_vm4 = vsmask.f32 (!%p1113_p12), 256 }
  0x23   : > { %s1454_s9 = smov (%p51_p13, %s1452_s9), 0  ;;  %s141_s23 = sadd.s32 %s662_s7, %s1438_s27  ;;  %708 = vmatprep.subr.bf16.mxu1 (!%p1113_p12), %v981_v0  ;;  %710 = vmatprep.mubr.msk.bf16.mxu1 (!%p1113_p12), %vm982_vm0, %v981_v0  ;;  %vm363_vm5 = vcmask (!%p1113_p12), 1042434   ;;  %vm364_vm6 = vsmask.f32 (!%p1113_p12), 2304  ;;  %vm1162_vm7 = vmand (!%p1113_p12), %vm341_vm3, %vm342_vm4  ;;  %vm371_vm8 = vcmask (!%p1113_p12), 1043459   ;;  %vm355_vm10 = vcmask (!%p1113_p12), 1041409  }
  0x24   : > { %1398 = sst [smem:[#allocation13_spill]] %s1454_s9  ;;  %s663_s22 = sshll.u32 %s141_s23, 1  ;;  %vm372_vm9 = vsmask.f32 (!%p1113_p12), 3328  ;;  %vm356_vm11 = vsmask.f32 (!%p1113_p12), 1280  ;;  %vm1170_vm12 = vmand (!%p1113_p12), %vm363_vm5, %vm364_vm6 }
  0x25   : > { %s144_s20 = ssub.s32 %s975_s24, %s1454_s9  ;;  %s143_s26 = sadd.s32 %s663_s22, %s1442_s28  ;;  %vm454_vm13 = vsmask.f32 (!%p1113_p12), 7938  ;;  %vm1182_vm14 = vmand (!%p1113_p12), %vm371_vm8, %vm372_vm9  ;;  %vm468_vm0 = vsmask.f32 (!%p1113_p12), 7946  ;;  %vm461_vm4 = vsmask.f32 (!%p1113_p12), 7942 }
  0x26   : > { %s145_s12 = ssub.s32 %s137_s8, %s143_s26  ;;  %s149_s3 = sadd.s32 1, %s935_s14  ;;  %vm1193_vm15 = vmand (!%p1113_p12), %vm355_vm10, %vm356_vm11 }
  0x27   : > { %s146_s25 = sor.u32 %s145_s12, %s144_s20  ;;  %218 = sbr.rel (%p1113_p12) target bundleno = 308 (0x134), region = 32  ;;  %vm1233_vm6 = vmand (!%p1113_p12), %vm363_vm5, %vm468_vm0 }
  0x28   : > { %p147_p0 = scmp.eq.s32.totalorder %s146_s25, 0  ;;  %p266_p1 = scmp.lt.s32.totalorder (!%p1113_p12), %s947_s17, 1  ;;  %vm1249_vm5 = vmand (!%p1113_p12), %vm355_vm10, %vm461_vm4 }
  0x29   : > { %p268_p2 = scmp.lt.s32.totalorder (!%p1113_p12), %s943_s16, 1  ;;  %p254_p3 = scmp.lt.s32.totalorder (!%p1113_p12), %s955_s19, 1 }
  0x2a   : > { %s1127_s4 = scalar_select %p147_p0, %s935_s14, %s149_s3  }
  0x2b   : > { %p256_p4 = scmp.lt.s32.totalorder (!%p1113_p12), %s951_s18, 3  ;;  %p258_p6 = scmp.lt.s32.totalorder (!%p1113_p12), %s939_s15, 3 }
  0x2c   : > { %s1399_s1 = sld [smem:[#allocation14_spill]] (!%p1113_p12)  ;;  %s688_s26 = sshll.u32 (!%p1113_p12), %s951_s18, 1 }
  0x2e   : > { %s267_s12 = scalar_select %p266_p1, %s947_s17, 1 }
  0x2f   : > { %s269_s3 = scalar_select %p268_p2, %s943_s16, 1 }
  0x30   : > { %s672_s20 = sshll.u32 %s267_s12, 2 }
  0x31   : > { %s671_s22 = sshll.u32 %s269_s3, 1 }
  0x32   : > { %s272_s23 = sadd.s32 %s672_s20, %s671_s22 }
  0x33   : > { %s673_s25 = sshll.u32 %s272_s23, 1 }
  0x34   : > { %s274_s5 = scalar_lea.vmem %s1399_s1, %s673_s25  ;;  %s510_s1 = sadd.s32 %s947_s17, %s688_s26 }
  0x35   : > { %v285_v1 = vld [vmem:[%s274_s5] sm:$0x3]  ;;  %s255_s6 = scalar_select %p254_p3, %s955_s19, 1  ;;  %v681_v2 = vld [vmem:[%s274_s5 + $0x2] sm:$0x3] }
  0x36   : > { %v298_v3 = vsel %vm296_vm1, %v285_v1, 0  ;;  %s257_s29 = scalar_select %p256_p4, %s951_s18, 3  ;;  %v404_v4 = vsel %vm296_vm1, %v681_v2, 0  ;;  %vm1225_vm1 = vmand %vm341_vm3, %vm454_vm13 }
  0x37   : > { %703 = vmatpush3.bf16.msra.mxu0 %v298_v3  ;;  %s259_s7 = scalar_select %p258_p6, %s939_s15, 3  ;;  %709 = vmatpush3.bf16.msra.mxu1 %v404_v4 }
  0x38   : > { %s668_s8 = sshll.u32 %s257_s29, 2  ;;  %s669_s12 = sshll.u32 %s255_s6, 4 }
  0x39   : > { %s261_s3 = sadd.s32 %s668_s8, %s259_s7  ;;  %s251_s5 = sand.u32 1, %s931_s13  }
  0x3a   : > { %s263_s20 = sadd.s32 %s669_s12, %s261_s3  ;;  %s667_s9 = sshll.u32 %s251_s5, 3 }
  0x3b   : > { %s670_s22 = sshll.u32 %s263_s20, 2  ;;  %s689_s30 = sshll.u32 %s510_s1, 2 }
  0x3c   : > { %s265_s10 = scalar_lea.vmem %s1370_s0, %s670_s22  ;;  %s1156_s7 = sadd.s32 %s939_s15, %s689_s30 }
  0x3d   : > { %v283_v5 = vld [vmem:[%s265_s10] sm:$0xf]  ;;  %s1158_s8 = scalar_lea.vmem [#allocation2], %s667_s9  ;;  %s690_s1 = sshll.u32 %s1156_s7, 1 }
  0x3e   : > { %705 = vmatmul.mubr.msk.bf16.vlgmr.msra.gmra.mrb[0].mxu0 %vm292_vm2, %v283_v5  ;;  %711 = vmatmul.mubr.msk.bf16.vlgmr.msra.gmra.mrb[0].mxu1 %vm292_vm2, %v283_v5  ;;  %v344_v8 = vld [vmem:[%s1158_s8] sm:$0x1]  ;;  %v366_v15 = vld [vmem:[%s1158_s8] sm:$0x4]  ;;  %v380_v22 = vld [vmem:[%s1158_s8 + $0x4] sm:$0x1]  ;;  %s1188_s15 = sadd.s32 %s943_s16, %s690_s1 }
  0x3f   : > { %v392_v23 = vld [vmem:[%s1158_s8 + $0x4] sm:$0x4]  ;;  %v398_v30 = vld [vmem:[%s1158_s8 + $0x4] sm:$0x8]  ;;  %v358_v33 = vld [vmem:[%s1158_s8] sm:$0x2] }
  0x40   : > { %v374_v34 = vld [vmem:[%s1158_s8] sm:$0x8]  ;;  %v386_v39 = vld [vmem:[%s1158_s8 + $0x4] sm:$0x2]  ;;  %s691_s16 = sshll.u32 %s1188_s15, 1  ;;  %s692_s17 = sshll.u32 %s955_s19, 7 }
  0x41   : > { %vm475_vm2 = vsmask.f32 7950  ;;  %s1230_s18 = sadd.s32 %s692_s17, %s691_s16  ;;  %s523_s30 = sshll.u32 %s1158_s8, 4  ;;  %s1278_s30 = int_to_ptr.vmem [resolvable:$true] %s523_s30 }
  0x42   : > { %vm1241_vm3 = vmand %vm371_vm8, %vm475_vm2  ;;  %s693_s19 = sshll.u32 %s1230_s18, 6  ;;  %s1416_s3 = sld [smem:[#allocation15_spill]] }
  0x43   : > { %s1294_s22 = scalar_lea.sflag [#allocation3], %s251_s5  ;;  %s837_s23 = scalar_lea.vmem %s1278_s30, 128 }
  0x44   : > { %p838_p7 = scmp.ne.s32.totalorder %s1278_s30, %s837_s23  ;;  %s983_s25 = smov [#allocation2]  }
  0x45   : > { %s841_s10 = sshll.u32 %s983_s25, 4  ;;  %s842_s10 = int_to_ptr.vmem [resolvable:$false] %s841_s10 }
  0x46   : > { %p839_p8 = pnand %p838_p7, %p1094_p5  ;;  %s843_s26 = scalar_lea.vmem %s842_s10, 256 }
  0x47   : > { %p844_p11 = scmp.lt.s32.totalorder %s1278_s30, %s842_s10  ;;  %p845_p12 = scmp.lt.s32.totalorder %s843_s26, %s837_s23 }
  0x48   : > { %s1276_s20 = scalar_lea.hbm %s1416_s3, %s693_s19  ;;  %p840_p9 = pneg %p839_p8 }
  0x49   : > { %p846_p13 = por %p845_p12, %p844_p11 }
  0x4b   : > { %p847_p0 = pnand %p846_p13, %p840_p9 }
 0x111   : > { %v334_v7 = vpop.f32.mrb[0].mxu0  ;;  %v440_v9 = vpop.f32.mrb[0].mxu1 }
 0x112   : > { %v335_v10 = vadd.f32 %v674_v6, %v334_v7  ;;  %v706_v11 = vpop.f32.mrb[1].mxu0  ;;  %v441_v12 = vadd.f32 %v674_v6, %v440_v9  ;;  %v712_v13 = vpop.f32.mrb[1].mxu1 }
 0x113   : > { %v337_v16 = vpop.f32.mrb[2].mxu0  ;;  %v443_v17 = vpop.f32.mrb[2].mxu1 }
 0x114   : > { %v340_v18 = vpack.c.bf16 %v335_v10, %v335_v10  ;;  %v707_v19 = vpop.f32.mrb[3].mxu0  ;;  %v713_v20 = vpop.f32.mrb[3].mxu1  ;;  %v1176_v24 = vpack.c.bf16 %v441_v12, %v441_v12 }
 0x116   : > { %v345_v25 = vsel %vm1162_vm7, %v340_v18, %v344_v8  ;;  %v351_v26 = vshrl.u32 %v340_v18, 16  ;;  %v361_v27 = vrot.slane %v340_v18, 7  ;;  %v677_v28 = vrot.slane %v340_v18, 10 }
 0x117   : > { %346 = vst [vmem:[%s1158_s8] sm:$0x1] %v345_v25  ;;  %v679_v31 = vrot.slane %v340_v18, 9  ;;  %v451_v43 = vshll.u32 %v1176_v24, 16  ;;  %v459_v58 = vrot.slane %v1176_v24, 7  ;;  %v473_v60 = vrot.slane %v1176_v24, 6 }
 0x118   : > { %v353_v35 = vrot.slane %v351_v26, 7  ;;  %v367_v36 = vsel %vm1170_vm12, %v361_v27, %v366_v15  ;;  %v369_v37 = vrot.slane %v351_v26, 6  ;;  %v381_v38 = vsel %vm1162_vm7, %v677_v28, %v380_v22 }
 0x119   : > { %368 = vst [vmem:[%s1158_s8] sm:$0x4] %v367_v36  ;;  %382 = vst [vmem:[%s1158_s8 + $0x4] sm:$0x1] %v381_v38  ;;  %v678_v40 = vrot.slane %v351_v26, 9  ;;  %v393_v41 = vsel %vm1170_vm12, %v679_v31, %v392_v23  ;;  %v399_v42 = vsel %vm1182_vm14, %v351_v26, %v398_v30  ;;  %v466_v48 = vrot.slane %v451_v43, 7 }
 0x11a   : > { %394 = vst [vmem:[%s1158_s8 + $0x4] sm:$0x4] %v393_v41  ;;  %v359_v44 = vsel %vm1193_vm15, %v353_v35, %v358_v33  ;;  %v375_v45 = vsel %vm1182_vm14, %v369_v37, %v374_v34  ;;  %400 = vst [vmem:[%s1158_s8 + $0x4] sm:$0x8] %v399_v42  ;;  %v684_v49 = vrot.slane %v451_v43, 10  ;;  %v686_v52 = vrot.slane %v451_v43, 9 }
 0x11b   : > { %360 = vst [vmem:[%s1158_s8] sm:$0x2] %v359_v44  ;;  %376 = vst [vmem:[%s1158_s8] sm:$0x8] %v375_v45  ;;  %v387_v46 = vsel %vm1193_vm15, %v678_v40, %v386_v39  ;;  %v685_v2 = vrot.slane %v1176_v24, 9 }
 0x11c   : > { %388 = vst [vmem:[%s1158_s8 + $0x4] sm:$0x2] %v387_v46 }
 0x11e   : > { %v456_v51 = vld [vmem:[%s1158_s8] sm:$0x1] }
 0x11f   : > { %v457_v53 = vsel %vm1225_vm1, %v451_v43, %v456_v51 }
 0x120   : > { %458 = vst [vmem:[%s1158_s8] sm:$0x1] %v457_v53  ;;  %v470_v56 = vld [vmem:[%s1158_s8] sm:$0x4]  ;;  %v483_v57 = vld [vmem:[%s1158_s8 + $0x4] sm:$0x1] }
 0x121   : > { %v471_v59 = vsel %vm1233_vm6, %v466_v48, %v470_v56  ;;  %v484_v61 = vsel %vm1225_vm1, %v684_v49, %v483_v57  ;;  %v495_v62 = vld [vmem:[%s1158_s8 + $0x4] sm:$0x4]  ;;  %v498_v63 = vld [vmem:[%s1158_s8 + $0x4] sm:$0x8] }
 0x122   : > { %v463_v0 = vld [vmem:[%s1158_s8] sm:$0x2]  ;;  %472 = vst [vmem:[%s1158_s8] sm:$0x4] %v471_v59  ;;  %v477_v1 = vld [vmem:[%s1158_s8] sm:$0x8]  ;;  %v496_v3 = vsel %vm1233_vm6, %v686_v52, %v495_v62  ;;  %v499_v4 = vsel %vm1241_vm3, %v1176_v24, %v498_v63 }
 0x123   : > { %485 = vst [vmem:[%s1158_s8 + $0x4] sm:$0x1] %v484_v61  ;;  %v464_v5 = vsel %vm1249_vm5, %v459_v58, %v463_v0  ;;  %v478_v6 = vsel %vm1241_vm3, %v473_v60, %v477_v1  ;;  %v489_v7 = vld [vmem:[%s1158_s8 + $0x4] sm:$0x2]  ;;  %497 = vst [vmem:[%s1158_s8 + $0x4] sm:$0x4] %v496_v3 }
 0x124   : > { %500 = vst [vmem:[%s1158_s8 + $0x4] sm:$0x8] %v499_v4  ;;  %465 = vst [vmem:[%s1158_s8] sm:$0x2] %v464_v5  ;;  %v490_v8 = vsel %vm1249_vm5, %v685_v2, %v489_v7 }
 0x125   : > { %479 = vst [vmem:[%s1158_s8] sm:$0x8] %v478_v6  ;;  %491 = vst [vmem:[%s1158_s8 + $0x4] sm:$0x2] %v490_v8 }
 0x126   : > { %850 = shalt.err (!%p847_p0)
}
 0x127   : > { %s851_s5 = scalar_lea.hbm %s1276_s20, 128  ;;  %s855_s7 = scalar_lea.hbm %s1416_s3, 16384 }
 0x128   : > { %p852_p1 = scmp.ne.s32.totalorder %s1276_s20, %s851_s5  ;;  %p856_p4 = scmp.lt.u32.totalorder %s1276_s20, %s1416_s3 }
 0x129   : > { %p857_p6 = scmp.lt.u32.totalorder %s855_s7, %s851_s5  ;;  %p859_p8 = scmp.lt.u32.totalorder %s851_s5, %s1276_s20 }
 0x12a   : > { %p853_p2 = pnand %p852_p1, %p1094_p5 }
 0x12b   : > { %p858_p7 = por %p857_p6, %p856_p4 }
 0x12c   : > { %p854_p3 = pneg %p853_p2 }
 0x12d   : > { %p860_p9 = por %p859_p8, %p858_p7 }
 0x12f   : > { %p861_p11 = pnand %p860_p9, %p854_p3 }
 0x131   : > { %864 = shalt.err (!%p861_p11)
}
 0x132   : > { %s984_s15 = smov 64   ;;  %s985_s16 = smov 4  }
 0x133   : > { %714 = dma.vmem_to_hbm [thread:$0]  (%p1094_p5), %s1278_s30, 128, %s1276_s20, %s1294_s22, %s984_s15, %s984_s15, %s985_s16  }
 0x134 PF: > { %s1417_s17 = sld [smem:[#allocation9_spill]]  ;;  %s1418_s18 = sld [smem:[#allocation5_spill]] }
 0x13a   : > { %p720_p12 = scmp.ge.s32.totalorder %s1417_s17, 2  ;;  %s538_s9 = sand.u32 1, %s1418_s18  }
 0x13b   : > { %s539_s12 = scalar_lea.sflag [#allocation3], %s538_s9 }
 0x13c   : > { %p717_p13 = pnand %p720_p12, %p1104_p10 }
 0x13e   : > { %922 = dma.done.wait (!%p717_p13), %s539_s12, 128  }
 0x13f   : > { %924 = vsyncadd (!%p717_p13), %s539_s12, 4294967168  ;;  %s16_s25 = sadd.s32 1, %s1417_s17   ;;  %s1421_s15 = sld [smem:[#allocation6_spill]] }
 0x140   : > { %p1323_p0 = scmp.ge.s32.totalorder %s16_s25, 130   ;;  %s1422_s17 = sld [smem:[#allocation7_spill]] }
 0x141   : > { %s1423_s18 = sld [smem:[#allocation8_spill]]  ;;  %s1424_s22 = sld [smem:[#allocation10_spill]] }
 0x142   : > { %s1425_s11 = sld [smem:[#allocation12_spill]]  ;;  %s1426_s30 = sld [smem:[#allocation13_spill]] }
 0x143   : > { %s1428_s12 = smov %s931_s13  ;;  %s1429_s13 = smov %s935_s14 }
 0x144   : > { %s1430_s14 = smov %s1127_s4  ;;  %s1431_s16 = smov %s963_s21 }
 0x145   : > { %s1432_s19 = smov %s975_s24  ;;  %s1433_s20 = smov %s1438_s27 }
 0x146   : > { %s1434_s21 = smov %s1442_s28  ;;  %15 = sbr.rel (!%p1323_p0) target bundleno = 11 (0xb), region = 71 }
 0x148   : > { %s1435_s23 = smov %s1425_s11  ;;  %s1436_s24 = smov %s1426_s30 }
 0x14d   :  { %544 = vsyncpa [#allocation3], 1 }
 0x14e   :  { %546 = vsyncpa [#allocation3 + $0x1], 1 }

</bundles_post_ra>
